<compile_context>
chip_gen: v7x
topology: tpu7x:2x2x1
jax: 0.10.0
libtpu: 0.0.40
codegen_flags: <defaults>
</compile_context>

<pallas_src>
import math

import jax
import jax.numpy as jnp
from jax.experimental import pallas as pl
from jax.experimental.pallas import tpu as pltpu


def _round_up(x: int, m: int) -> int:
    return ((x + m - 1) // m) * m


def _sinusoidal_kernel(time_ref, tab_ref, out_ref):
    # time_ref: (TILE_R, k)        f32 — k packed batch rows per output row
    # tab_ref : (k + 1, k*dim)     f32 — row 0: phase, row 1+j: freqs for seg j
    # out_ref : (TILE_R, k*dim)    out dtype
    t = time_ref[...]                               # (R, k)
    k = t.shape[1]
    arg = tab_ref[0:1, :]                           # phase row, broadcasts over R
    for j in range(k):                              # static unroll (k small)
        # segment-masked MAC: tab row (1+j) is freqs in lanes [j*dim,(j+1)*dim),
        # zero elsewhere, so each packed batch row only contributes to its segment.
        arg = arg + t[:, j:j + 1] * tab_ref[j + 1:j + 2, :]
    # Single fused VPU expression + one dense store; cos half comes from the
    # pi/2 phase so there is no lane-axis concatenate / XLU shuffle.
    out_ref[...] = jnp.sin(arg).astype(out_ref.dtype)


def _choose_tile_rows(rows: int, row_bytes: int) -> int:
    # ~4 MiB output tile (double-buffered ~8 MiB): safe on v5e/v6e (128 MiB
    # VMEM) and v7x (64 MiB), big enough that the ~0.35 us/step overhead is <1%.
    target = max(8, (4 * 1024 * 1024) // row_bytes)
    target = _round_up(target, 8)
    if rows > 16:
        # Keep >= 2 grid steps so dimension_semantics=("parallel",) can feed
        # both v7x TensorCores even when the whole batch fits one 4 MiB tile.
        target = min(target, _round_up(pl.cdiv(rows, 2), 8))
    if rows <= target:
        return rows                                  # single full-extent block
    return target


def sinusoidal_position_embeddings(
    time: jax.Array, dim: int, out_dtype=jnp.float32
) -> jax.Array:
    """time: (B,) -> (B, dim) embeddings, [sin(t*f) | cos(t*f)]."""
    assert dim % 2 == 0, "dim must be even"
    assert dim >= 4, "dim must be >= 4 (half_dim - 1 must be nonzero)"
    half_dim = dim // 2
    b = time.shape[0]

    # Lane-packing factor: make the output block a multiple of 128 lanes.
    if dim % 128 == 0:
        k = 1
    elif 128 % dim == 0 and b % (128 // dim) == 0:
        k = 128 // dim
    else:
        k = 1  # correct fallback; stores are lane-masked if dim % 128 != 0
    rows = b // k
    width = k * dim

    # Hoisted tables (computed once in the wrapper, resident across grid steps).
    scale = -math.log(1000.0) / (half_dim - 1)
    f = jnp.exp(jnp.arange(half_dim, dtype=jnp.float32) * jnp.float32(scale))
    freqs_full = jnp.concatenate([f, f])                              # (dim,)
    phase = jnp.concatenate(
        [jnp.zeros((half_dim,), jnp.float32),
         jnp.full((half_dim,), jnp.float32(math.pi / 2))])            # (dim,)
    phase_wide = jnp.tile(phase, k)[None, :]                          # (1, width)
    seg = jnp.eye(k, dtype=jnp.float32)                               # (k, k)
    freq_rows = (seg[:, :, None] * freqs_full[None, None, :]).reshape(k, width)
    tab = jnp.concatenate([phase_wide, freq_rows], axis=0)            # (k+1, width)

    time_rows = time.astype(jnp.float32).reshape(rows, k)

    row_bytes = width * jnp.dtype(out_dtype).itemsize
    tile_rows = _choose_tile_rows(rows, row_bytes)
    grid = (pl.cdiv(rows, tile_rows),)

    out = pl.pallas_call(
        _sinusoidal_kernel,
        out_shape=jax.ShapeDtypeStruct((rows, width), out_dtype),
        grid=grid,
        in_specs=[
            pl.BlockSpec((tile_rows, k), lambda i: (i, 0)),       # time rows
            pl.BlockSpec((k + 1, width), lambda i: (0, 0)),       # tables (resident)
        ],
        out_specs=pl.BlockSpec((tile_rows, width), lambda i: (i, 0)),
        compiler_params=pltpu.CompilerParams(
            dimension_semantics=("parallel",),
        ),
    )(time_rows, tab)

    # (rows, k*dim) row-major is bit-identical to (b, dim) row-major: free reshape,
    # no pad, no trailing slice.
    return out.reshape(b, dim)


def _reference(time: jax.Array, dim: int) -> jax.Array:
    half_dim = dim // 2
    emb = math.log(1000.0) / (half_dim - 1)
    emb = jnp.exp(jnp.arange(half_dim, dtype=jnp.float32) * -emb)
    emb = time.astype(jnp.float32)[:, None] * emb[None, :]
    return jnp.concatenate([jnp.sin(emb), jnp.cos(emb)], axis=-1)


if __name__ == "__main__":
    key = jax.random.PRNGKey(0)
    batch, dim = 8, 32  # half_dim = 16; packed path (k = 4 -> 128-lane stores)

    # deterministic example "timesteps"
    time = jax.random.uniform(key, (batch,), dtype=jnp.float32) * 1000.0

    out = jax.block_until_ready(sinusoidal_position_embeddings(time, dim))
    ref = _reference(time, dim)
    assert out.shape == (batch, dim)
    # cos is computed as sin(x + pi/2); for |x| ~ 1e3 the fp32 rounding of the
    # phase add is ~0.5 ulp(x) ~ 3e-5 in the argument, so allow 2e-4 here.
    assert jnp.allclose(out, ref, atol=2e-4, rtol=1e-4)

    # Extra coverage: dim % 128 == 0 with a ragged multi-step grid, and a
    # fallback dim (neither divides 128 nor is a multiple of it).
    for b2, d2 in ((100, 128), (10, 48)):
        t2 = jax.random.uniform(jax.random.PRNGKey(1), (b2,), jnp.float32) * 1000.0
        o2 = jax.block_until_ready(sinusoidal_position_embeddings(t2, d2))
        r2 = _reference(t2, d2)
        assert o2.shape == (b2, d2)
        assert jnp.allclose(o2, r2, atol=2e-4, rtol=1e-4)

    print("KERNEL_OK")
</pallas_src>

<mosaic_0001>
module attributes {stable_mosaic.version = 11 : i64} {
  func.func @_sinusoidal_kernel(%arg0: i32, %arg1: memref<2x4xf32, #tpu.memory_space<vmem>>, %arg2: memref<5x128xf32, #tpu.memory_space<vmem>>, %arg3: memref<2x128xf32, #tpu.memory_space<vmem>>) attributes {dimension_semantics = [#tpu.dimension_semantics<parallel>], iteration_bounds = array<i64: 1>, scalar_prefetch = 0 : i64, scratch_operands = 0 : i64, tpu.core_type = #tpu.core_type<tc>, window_params = [{transform_indices = @transform_0, window_bounds = array<i64: 2, 4>}, {pipeline_mode = #tpu.pipeline_mode<synchronous>, transform_indices = @transform_1, window_bounds = array<i64: 5, 128>}, {transform_indices = @transform_2, window_bounds = array<i64: 2, 128>}]} {
    %c0 = arith.constant 0 : index
    %c0_0 = arith.constant 0 : index
    %0 = vector.load %arg1[%c0, %c0_0] : memref<2x4xf32, #tpu.memory_space<vmem>>, vector<2x4xf32>
    %c0_1 = arith.constant 0 : index
    %c0_2 = arith.constant 0 : index
    %1 = vector.load %arg2[%c0_1, %c0_2] : memref<5x128xf32, #tpu.memory_space<vmem>>, vector<1x128xf32>
    %2 = vector.extract_strided_slice %0 {offsets = [0, 0], sizes = [2, 1], strides = [1, 1]} : vector<2x4xf32> to vector<2x1xf32>
    %c1 = arith.constant 1 : index
    %c0_3 = arith.constant 0 : index
    %3 = vector.load %arg2[%c1, %c0_3] : memref<5x128xf32, #tpu.memory_space<vmem>>, vector<1x128xf32>
    %4 = vector.broadcast %2 : vector<2x1xf32> to vector<2x128xf32>
    %5 = vector.broadcast %3 : vector<1x128xf32> to vector<2x128xf32>
    %6 = arith.mulf %4, %5 : vector<2x128xf32>
    %7 = vector.broadcast %1 : vector<1x128xf32> to vector<2x128xf32>
    %8 = arith.addf %7, %6 : vector<2x128xf32>
    %9 = vector.extract_strided_slice %0 {offsets = [0, 1], sizes = [2, 1], strides = [1, 1]} : vector<2x4xf32> to vector<2x1xf32>
    %c2 = arith.constant 2 : index
    %c0_4 = arith.constant 0 : index
    %10 = vector.load %arg2[%c2, %c0_4] : memref<5x128xf32, #tpu.memory_space<vmem>>, vector<1x128xf32>
    %11 = vector.broadcast %9 : vector<2x1xf32> to vector<2x128xf32>
    %12 = vector.broadcast %10 : vector<1x128xf32> to vector<2x128xf32>
    %13 = arith.mulf %11, %12 : vector<2x128xf32>
    %14 = arith.addf %8, %13 : vector<2x128xf32>
    %15 = vector.extract_strided_slice %0 {offsets = [0, 2], sizes = [2, 1], strides = [1, 1]} : vector<2x4xf32> to vector<2x1xf32>
    %c3 = arith.constant 3 : index
    %c0_5 = arith.constant 0 : index
    %16 = vector.load %arg2[%c3, %c0_5] : memref<5x128xf32, #tpu.memory_space<vmem>>, vector<1x128xf32>
    %17 = vector.broadcast %15 : vector<2x1xf32> to vector<2x128xf32>
    %18 = vector.broadcast %16 : vector<1x128xf32> to vector<2x128xf32>
    %19 = arith.mulf %17, %18 : vector<2x128xf32>
    %20 = arith.addf %14, %19 : vector<2x128xf32>
    %21 = vector.extract_strided_slice %0 {offsets = [0, 3], sizes = [2, 1], strides = [1, 1]} : vector<2x4xf32> to vector<2x1xf32>
    %c4 = arith.constant 4 : index
    %c0_6 = arith.constant 0 : index
    %22 = vector.load %arg2[%c4, %c0_6] : memref<5x128xf32, #tpu.memory_space<vmem>>, vector<1x128xf32>
    %23 = vector.broadcast %21 : vector<2x1xf32> to vector<2x128xf32>
    %24 = vector.broadcast %22 : vector<1x128xf32> to vector<2x128xf32>
    %25 = arith.mulf %23, %24 : vector<2x128xf32>
    %26 = arith.addf %20, %25 : vector<2x128xf32>
    %27 = math.sin %26 : vector<2x128xf32>
    %c0_7 = arith.constant 0 : index
    %c0_8 = arith.constant 0 : index
    %28 = vector.load %arg3[%c0_7, %c0_8] : memref<2x128xf32, #tpu.memory_space<vmem>>, vector<2x128xf32>
    tpu.vector_store %arg3[%c0_7, %c0_8], %27 {strides = array<i32>} : memref<2x128xf32, #tpu.memory_space<vmem>>, vector<2x128xf32>,
    return
  }
  func.func @transform_0(%arg0: i32) -> (i32, i32) {
    %c0_i32 = arith.constant 0 : i32
    %c0_i32_0 = arith.constant 0 : i32
    return %arg0, %c0_i32 : i32, i32
  }
  func.func @transform_1(%arg0: i32) -> (i32, i32) {
    %c0_i32 = arith.constant 0 : i32
    %c0_i32_0 = arith.constant 0 : i32
    %c0_i32_1 = arith.constant 0 : i32
    return %c0_i32, %c0_i32_0 : i32, i32
  }
  func.func @transform_2(%arg0: i32) -> (i32, i32) {
    %c0_i32 = arith.constant 0 : i32
    %c0_i32_0 = arith.constant 0 : i32
    return %arg0, %c0_i32 : i32, i32
  }
}

</mosaic_0001>

<bundles_post_ra>
// kernel: tpu_custom_call.1
= control target key start
LH: loop header
LB: loop body
LE: loop exit
PB: predicated region body
PF: predicated region fallthrough
CT: control target
= control target key end

     0   :  { %7 = vsyncpa [#allocation3], 0  ;;  %s400_s0 = inlined_call_operand.hbm [shape: f32[2,4], index: 0, kind: input, shape index: {}]   ;;  %s401_s1 = inlined_call_operand.hbm [shape: f32[5,128], index: 1, kind: input, shape index: {}]   ;;  %s402_s2 = inlined_call_operand.hbm [shape: f32[2,128], index: 2, kind: output, shape index: {}]  }
   0x1   :  { %8 = vsyncpa [#allocation6], 0 }
   0x2   :  { %9 = vsyncpa [#allocation4], 0  ;;  %s315_s9 = smov [#allocation2]   ;;  %s316_s11 = smov [#allocation5]  }
   0x3   :  { %s16_s10 = sshll.u32 %s315_s9, 4  ;;  %s26_s12 = sshll.u32 %s316_s11, 4  ;;  %s17_s10 = int_to_ptr.vmem [resolvable:$true] %s16_s10  ;;  %s27_s12 = int_to_ptr.vmem [resolvable:$true] %s26_s12 }
   0x4   :  { %s243_s15 = scalar_lea.hbm %s400_s0, 32 }
   0x5   :  { %p244_p0 = scmp.ne.s32.totalorder %s400_s0, %s243_s15  ;;  %p247_p1 = scmp.lt.u32.totalorder %s243_s15, %s400_s0 }
   0x7   :  { %p249_p2 = pnand %p247_p1, %p244_p0 }
   0x9   :  { %252 = shalt.err (!%p249_p2)
}
   0xa   :  { %s253_s20 = scalar_lea.vmem %s17_s10, 32  ;;  %p258_p4 = scmp.lt.s32.totalorder %s17_s10, %s17_s10 }
   0xb   :  { %p254_p3 = scmp.ne.s32.totalorder %s17_s10, %s253_s20  ;;  %p259_p5 = scmp.lt.s32.totalorder %s253_s20, %s253_s20 }
   0xd   :  { %p260_p6 = por %p259_p5, %p258_p4 }
   0xf   :  { %p261_p7 = pnand %p260_p6, %p254_p3 }
  0x11   :  { %264 = shalt.err (!%p261_p7)
}
  0x12   :  { %19 = dma.hbm_to_vmem [thread:$0]  %s400_s0, 32, %s17_s10, [#allocation3]  }
  0x13   :  { %s265_s25 = scalar_lea.hbm %s401_s1, 128 }
  0x14   :  { %p266_p8 = scmp.ne.s32.totalorder %s401_s1, %s265_s25  ;;  %p269_p9 = scmp.lt.u32.totalorder %s265_s25, %s401_s1 }
  0x16   :  { %p271_p10 = pnand %p269_p9, %p266_p8 }
  0x18   :  { %274 = shalt.err (!%p271_p10)
}
  0x19   :  { %s275_s30 = scalar_lea.vmem %s27_s12, 128  ;;  %p280_p12 = scmp.lt.s32.totalorder %s27_s12, %s27_s12 }
  0x1a   :  { %p276_p11 = scmp.ne.s32.totalorder %s27_s12, %s275_s30  ;;  %p281_p13 = scmp.lt.s32.totalorder %s275_s30, %s275_s30 }
  0x1c   :  { %p282_p0 = por %p281_p13, %p280_p12 }
  0x1e   :  { %p283_p1 = pnand %p282_p0, %p276_p11 }
  0x20   :  { %286 = shalt.err (!%p283_p1)
}
  0x21   :  { %29 = dma.hbm_to_vmem [thread:$0]  %s401_s1, 128, %s27_s12, [#allocation6]  }
  0x22   :  { %309 = dma.done.wait [#allocation3], 32  }
  0x23   :  { %310 = vsyncadd [#allocation3], 4294967264 }
  0x24   :  { %311 = dma.done.wait [#allocation6], 128  }
  0x25   :  { %312 = vsyncadd [#allocation6], 4294967168  ;;  %v317_v0 = vmov 0   ;;  %v318_v1 = vmov 2   ;;  %v36_v2 = vld [vmem:[#allocation2] sm:$0x3] }
  0x26   :  { %234 = vset.pattern.permute.xlu0 %v317_v0  ;;  %236 = vset.pattern.permute.xlu1 %v318_v1  ;;  %v319_v3 = vmov 1   ;;  %v320_v4 = vmov 3   ;;  %v208_v5 = vld [vmem:[#allocation5 + $0x1] ss:$0 sm:$0xff]  ;;  %v209_v9 = vld [vmem:[#allocation5] ss:$0 sm:$0xff] }
  0x27   :  { %41 = vperm.xlu0 %234, %v36_v2   ;;  %67 = vperm.xlu1 %236, %v36_v2   ;;  %v210_v10 = vld [vmem:[#allocation5 + $0x2] ss:$0 sm:$0xff]  ;;  %v211_v11 = vld [vmem:[#allocation5 + $0x3] ss:$0 sm:$0xff]  ;;  %v212_v13 = vld [vmem:[#allocation5 + $0x4] ss:$0 sm:$0xff] }
  0x28   :  { %v321_v33 = vmov 2102212464   ;;  %v322_v35 = vmov 920167782   ;;  %v323_v39 = vmov 1326507024  }
  0x29   :  { %v324_v41 = vmov 683565275   ;;  %v325_v43 = vmov 2475754826   ;;  %v326_v46 = vmov 2131351028  }
  0x2a   :  { %s327_s1 = smov [#allocation7]  }
  0x2b   :  { %235 = vset.pattern.permute.xlu0 %v319_v3  ;;  %237 = vset.pattern.permute.xlu1 %v320_v4  ;;  %s198_s4 = sshll.u32 %s327_s1, 4  ;;  %s199_s4 = int_to_ptr.vmem [resolvable:$true] %s198_s4 }
  0x2c   :  { %56 = vperm.xlu0 %235, %v36_v2   ;;  %78 = vperm.xlu1 %237, %v36_v2   ;;  %s287_s5 = scalar_lea.vmem %s199_s4, 32  ;;  %p292_p3 = scmp.lt.s32.totalorder %s199_s4, %s199_s4 }
  0x2d   :  { %p288_p2 = scmp.ne.s32.totalorder %s199_s4, %s287_s5  ;;  %p293_p4 = scmp.lt.s32.totalorder %s287_s5, %s287_s5 }
  0x2f   :  { %p294_p5 = por %p293_p4, %p292_p3 }
  0x30   :  { %238 = vset.pattern.permute.xlu0 %v320_v4 }
  0x31   :  { %p295_p6 = pnand %p294_p5, %p288_p2 }
  0xa6   :  { %v42_v6 = vpop.permute.xlu0 %41  ;;  %v68_v7 = vpop.permute.xlu1 %67 }
  0xa7   :  { %v48_v8 = vmul.f32 %v208_v5, %v42_v6  ;;  %v74_v17 = vmul.f32 %v211_v11, %v68_v7 }
  0xa9   :  { %v53_v15 = vadd.f32 %v209_v9, %v48_v8 }
  0xab   :  { %v57_v12 = vpop.permute.xlu0 %56  ;;  %v79_v14 = vpop.permute.xlu1 %78 }
  0xac   :  { %v63_v16 = vmul.f32 %v210_v10, %v57_v12  ;;  %v85_v19 = vmul.f32 %v212_v13, %v79_v14 }
  0xae   :  { %v64_v18 = vadd.f32 %v63_v16, %v53_v15 }
  0xb0   :  { %v75_v20 = vadd.f32 %v74_v17, %v64_v18 }
  0xb2   :  { %v367_v21 = vadd.f32 %v85_v19, %v75_v20 }
  0xb4   :  { %v90_v22 = vand.u32 2139095040, %v367_v21  ;;  %v87_v23 = vand.u32 2147483647, %v367_v21  ;;  %vm89_vm7 = vcmp.lt.s32.totalorder %v367_v21, 0  ;;  %vm179_vm12 = vweird.f32 %v367_v21 }
  0xb6   :  { %v91_v24 = vshrl.u32 %v90_v22, 23  ;;  %v94_v26 = vand.u32 8388607, %v87_v23  ;;  %vm88_vm8 = vcmp.le.f32.partialorder %v87_v23, 0.7853982 }
  0xb8   :  { %v213_v25 = vadd.s32 4294967169, %v91_v24  ;;  %v95_v29 = vor.u32 8388608, %v94_v26 }
  0xba   :  { %v97_v27 = vadd.s32 1, %v213_v25  ;;  %v135_v37 = vshll.u32 %v95_v29, 8 }
  0xbc   :  { %vm98_vm0 = vcmp.gt.s32.totalorder %v97_v27, 0 }
  0xbd   :  { %v99_v28 = vsel %vm98_vm0, %v97_v27, 0 }
  0xbe   :  { %v101_v30 = vand.u32 31, %v99_v28  ;;  %v100_v31 = vshrl.u32 %v99_v28, 5 }
  0xc0   :  { %v102_v32 = vsub.s32 32, %v101_v30  ;;  %v113_v34 = vshll.u32 %v321_v33, %v101_v30  ;;  %v116_v36 = vshll.u32 %v322_v35, %v101_v30  ;;  %v104_v42 = vshll.u32 %v324_v41, %v101_v30 }
  0xc1   :  { %v107_v45 = vshll.u32 %v325_v43, %v101_v30  ;;  %v110_v48 = vshll.u32 %v326_v46, %v101_v30  ;;  %vm122_vm1 = vcmp.lt.s32.totalorder %v100_v31, 4  ;;  %vm119_vm2 = vcmp.lt.s32.totalorder %v100_v31, 1 }
  0xc2   :  { %v114_v38 = vshrl.u32 %v322_v35, %v102_v32  ;;  %v117_v40 = vshrl.u32 %v323_v39, %v102_v32  ;;  %v105_v44 = vshrl.u32 %v325_v43, %v102_v32  ;;  %v108_v47 = vshrl.u32 %v326_v46, %v102_v32 }
  0xc3   :  { %v111_v49 = vshrl.u32 %v321_v33, %v102_v32  ;;  %v103_v53 = vshrl.u32 %v324_v41, %v102_v32  ;;  %vm120_vm3 = vcmp.lt.s32.totalorder %v100_v31, 2  ;;  %vm121_vm4 = vcmp.lt.s32.totalorder %v100_v31, 3 }
  0xc4   :  { %v115_v50 = vor.u32 %v114_v38, %v113_v34  ;;  %v118_v51 = vor.u32 %v117_v40, %v116_v36  ;;  %v106_v52 = vor.u32 %v105_v44, %v104_v42  ;;  %v109_v54 = vor.u32 %v108_v47, %v107_v45 }
  0xc5   :  { %v112_v55 = vor.u32 %v111_v49, %v110_v48 }
  0xc6   :  { %v128_v56 = vsel %vm122_vm1, %v115_v50, 920167782  ;;  %v132_v57 = vsel %vm122_vm1, %v118_v51, 1326507024  ;;  %v127_v59 = vsel %vm119_vm2, %v106_v52, %v109_v54  ;;  %v123_v62 = vsel %vm119_vm2, %v103_v53, %v106_v52 }
  0xc7   :  { %v124_v58 = vsel %vm122_vm1, %v112_v55, 2102212464  ;;  %v129_v60 = vsel %vm121_vm4, %v112_v55, %v128_v56  ;;  %v131_v61 = vsel %vm119_vm2, %v109_v54, %v112_v55  ;;  %v133_v1 = vsel %vm121_vm4, %v115_v50, %v132_v57 }
  0xc8   :  { %v125_v63 = vsel %vm121_vm4, %v109_v54, %v124_v58  ;;  %v130_v0 = vsel %vm120_vm3, %v127_v59, %v129_v60  ;;  %v134_v2 = vsel %vm120_vm3, %v131_v61, %v133_v1 }
  0xc9   :  { %v373_v3 = vmul.u32.u64.low %v135_v37, %v130_v0  ;;  %v374_v4 = vmul.u32.u64.high %v135_v37, %v130_v0, %v373_v3  ;;  %v376_v5 = vmul.u32.u64.low %v135_v37, %v134_v2  ;;  %v377_v6 = vmul.u32.u64.high %v135_v37, %v134_v2, %v376_v5 }
  0xca   :  { %v126_v7 = vsel %vm120_vm3, %v123_v62, %v125_v63 }
  0xcb   :  { %v145_v8 = vadd.s32 1, %v374_v4  ;;  %v142_v9 = vmul.u32 %v135_v37, %v126_v7  ;;  %vm144_vm5 = vc.u32 %v377_v6, %v373_v3  ;;  %v143_v22 = vadd.s32 %v373_v3, %v377_v6 }
  0xcd   :  { %v146_v10 = vsel %vm144_vm5, %v145_v8, %v374_v4 }
  0xce   :  { %v147_v11 = vadd.s32 %v146_v10, %v142_v9 }
  0xd0   :  { %v148_v12 = vadd.s32 536870912, %v147_v11 }
  0xd2   :  { %v149_v13 = vshrl.u32 %v148_v12, 30 }
  0xd4   :  { %v150_v14 = vshll.u32 %v149_v13, 30  ;;  %v173_v35 = vsub.s32 4, %v149_v13 }
  0xd6   :  { %v151_v15 = vsub.s32 %v147_v11, %v150_v14  ;;  %v174_v38 = vsel %vm89_vm7, %v173_v35, %v149_v13 }
  0xd7   :  { %v176_v40 = vsel %vm88_vm8, 0, %v174_v38 }
  0xd8   :  { %v153_v16 = vsub.s32 0, %v151_v15  ;;  %v180_v41 = vadd.s32 3, %v176_v40 }
  0xda   :  { %v214_v17 = vmin.u32 %v153_v16, %v151_v15  ;;  %v181_v42 = vand.u32 3, %v180_v41 }
  0xdc   :  { %v155_v18 = vclz %v214_v17  ;;  %vm186_vm9 = vcmp.eq.s32.totalorder %v181_v42, 2  ;;  %vm183_vm10 = vcmp.eq.s32.totalorder %v181_v42, 0  ;;  %vm182_vm11 = vcmp.lt.s32.totalorder %v181_v42, 2 }
  0xde   :  { %v215_v19 = vadd.s32 4294967294, %v155_v18 }
  0xe0   :  { %vm216_vm6 = vcmp.lt.s32.totalorder %v215_v19, 0 }
  0xe1   :  { %v158_v20 = vsel %vm216_vm6, 0, %v215_v19 }
  0xe2   :  { %v159_v24 = vsub.s32 32, %v158_v20  ;;  %v163_v25 = vsub.s32 4294967266, %v158_v20  ;;  %v160_v26 = vshll.u32 %v151_v15, %v158_v20 }
  0xe4   :  { %v161_v27 = vshrl.u32 %v143_v22, %v159_v24  ;;  %v164_v28 = vadd.s32 127, %v163_v25 }
  0xe6   :  { %v162_v29 = vor.u32 %v161_v27, %v160_v26  ;;  %v165_v30 = vshll.u32 %v164_v28, 23 }
  0xe8   :  { %v166_v31 = vor.u32 4788187, %v165_v30  ;;  %v169_v33 = vcvt.s32.f32 %v162_v29 }
  0xea   :  { %v167_v32 = vand.u32 2147483647, %v166_v31 }
  0xec   :  { %v170_v34 = vmul.f32 %v169_v33, %v167_v32 }
  0xee   :  { %v171_v36 = vxor.u32 2147483648, %v170_v34 }
  0xf0   :  { %v172_v37 = vsel %vm89_vm7, %v171_v36, %v170_v34 }
  0xf1   :  { %v175_v39 = vsel %vm88_vm8, %v367_v21, %v172_v37 }
  0xf2   :  { %239 = vcosq.f32 %v175_v39 }
  0xf3   :  { %241 = vsinq.f32 %v175_v39 }
  0xfc   :  { %v240_v43 = vpop.eup %239 }
  0xfd   :  { %v242_v44 = vpop.eup %241  ;;  %v187_v45 = vxor.u32 2147483648, %v240_v43 }
  0xfe   :  { %v184_v46 = vxor.u32 2147483648, %v242_v44 }
  0xff   :  { %v188_v47 = vsel %vm186_vm9, %v187_v45, %v242_v44 }
 0x100   :  { %v185_v23 = vsel %vm183_vm10, %v240_v43, %v184_v46 }
 0x101   :  { %v189_v48 = vsel %vm182_vm11, %v185_v23, %v188_v47 }
 0x102   :  { %v190_v49 = vsel %vm179_vm12, nan, %v189_v48 }
 0x103   :  { %191 = vst [vmem:[#allocation7] sm:$0x3] %v190_v49 }
 0x104   :  { %298 = shalt.err (!%p295_p6)
}
 0x105   :  { %s299_s8 = scalar_lea.hbm %s402_s2, 32 }
 0x106   :  { %p300_p7 = scmp.ne.s32.totalorder %s402_s2, %s299_s8  ;;  %p303_p8 = scmp.lt.u32.totalorder %s299_s8, %s402_s2 }
 0x108   :  { %p305_p9 = pnand %p303_p8, %p300_p7 }
 0x10a   :  { %308 = shalt.err (!%p305_p9)
}
 0x10b   :  { %201 = dma.vmem_to_hbm [thread:$0]  %s199_s4, 32, %s402_s2, [#allocation4]  }
 0x10c   :  { %313 = dma.done.wait [#allocation4], 32  }
 0x10d   :  { %314 = vsyncadd [#allocation4], 4294967264 }
 0x10e   :  { %205 = vsyncpa [#allocation3], 1 }
 0x10f   :  { %206 = vsyncpa [#allocation6], 1 }
 0x110   :  { %207 = vsyncpa [#allocation4], 1 }

</bundles_post_ra>
